<compile_context>
chip_gen: v5e
topology: v5e:2x2
jax: 0.10.0
libtpu: 0.0.40
codegen_flags: <defaults>
</compile_context>

<pallas_src>
import functools

import jax
import jax.numpy as jnp
from jax.experimental import pallas as pl
from jax.experimental.pallas import tpu as pltpu


def _sublane_multiple(dtype):
    """Min second-minor tile: 8 for 4-byte, 16 for 2-byte, 32 for 1-byte."""
    itemsize = jnp.dtype(dtype).itemsize
    return 8 * max(1, 4 // itemsize)


def _vmem_capacity_bytes():
    try:
        info = pltpu.get_tpu_info()
        return int(getattr(info, "vmem_capacity_bytes", 64 * 1024 * 1024))
    except Exception:
        # Conservative (v7x-sized) fallback; safe on every generation.
        return 64 * 1024 * 1024


def _iou_partial_kernel(p_ref, t_ref, o_ref, iand_acc, s_acc, *,
                        tn, chunk, n_valid, hw, mask_cols):
    """Accumulate per-row iand / (iand+ior) over HW chunks; finalize at last k."""
    i = pl.program_id(0)
    k = pl.program_id(1)
    nk = pl.num_programs(1)

    @pl.when(k == 0)
    def _():
        iand_acc[...] = jnp.zeros_like(iand_acc)
        s_acc[...] = jnp.zeros_like(s_acc)

    p = p_ref[...].astype(jnp.float32)   # (TN, CHUNK)
    t = t_ref[...].astype(jnp.float32)   # (TN, CHUNK)

    if mask_cols:
        # Last HW chunk over-reads; zero out the invalid lanes (static flag,
        # VPU has huge slack under the DMA-bound roofline).
        col = jax.lax.broadcasted_iota(jnp.int32, (tn, chunk), 1) + k * chunk
        valid = col < hw
        p = jnp.where(valid, p, 0.0)
        t = jnp.where(valid, t, 0.0)

    # Two reductions per row: iand = sum(t*p); s = sum(t+p); ior = s - iand.
    iand_acc[...] += jnp.sum(t * p, axis=1, keepdims=True)   # (TN, 1)
    s_acc[...] += jnp.sum(t + p, axis=1, keepdims=True)      # (TN, 1)

    @pl.when(k == nk - 1)
    def _():
        iand = iand_acc[...]
        ior = s_acc[...] - iand
        # Mask rows past the end of the (N, HW) input (no jnp.pad copy; the
        # last row block may over-read garbage, which is selected away here).
        row = jax.lax.broadcasted_iota(jnp.int32, (tn, 1), 0) + i * tn
        contrib = jnp.where(row < n_valid, 1.0 - iand / ior, 0.0)
        # Lane-dense partial output: broadcast the block's scalar partial sum
        # across a full 128-lane row (unmasked vst).
        partial = jnp.sum(contrib, keepdims=True)             # (1, 1)
        o_ref[...] = jnp.broadcast_to(partial, (1, 128))


def iou_loss(pred, target, *, target_block_bytes=None):
    """pred/target: (B, C, H, W). Returns scalar IoU loss (classes averaged).

    Matches PyTorch IOU(classes_average=True, weighted=False).forward.
    Accepts f32 / bf16 / int8 inputs; compute is done in f32 in-kernel.
    """
    B, C, H, W = pred.shape
    N = B * C
    HW = H * W

    pred_f = pred.reshape(N, HW)
    target_f = target.reshape(N, HW)

    isize = max(jnp.dtype(pred.dtype).itemsize, jnp.dtype(target.dtype).itemsize)
    sub = max(_sublane_multiple(pred.dtype), _sublane_multiple(target.dtype))

    vmem_cap = _vmem_capacity_bytes()
    big_vmem = vmem_cap >= 96 * 1024 * 1024           # v5e / v6e (128 MiB)
    if target_block_bytes is None:
        target_block_bytes = (20 if big_vmem else 8) * 1024 * 1024
    vmem_limit_bytes = (96 if big_vmem else 48) * 1024 * 1024

    n_rounded = pl.cdiv(N, sub) * sub

    if HW * isize * sub <= target_block_bytes:
        # Whole rows fit: single HW chunk, no column masking.
        chunk = HW
        mask_cols = False
        tn = (target_block_bytes // (HW * isize)) // sub * sub
        tn = max(sub, min(tn, n_rounded))
    else:
        # Large image: tile the lane axis; chunk is a multiple of 128 < HW.
        tn = sub
        chunk = max(128, (target_block_bytes // (sub * isize)) // 128 * 128)
        mask_cols = (HW % chunk) != 0

    # Megacore (v7x has 2 TensorCores): prefer >= 2 row blocks when possible.
    if N > sub:
        tn = min(tn, max(sub, (pl.cdiv(N, 2) // sub) * sub))

    num_i = pl.cdiv(N, tn)     # leading axis may not divide N (no pad copy)
    num_k = pl.cdiv(HW, chunk)

    kernel = functools.partial(
        _iou_partial_kernel,
        tn=tn, chunk=chunk, n_valid=N, hw=HW, mask_cols=mask_cols)

    partials = pl.pallas_call(
        kernel,
        out_shape=jax.ShapeDtypeStruct((num_i, 128), jnp.float32),
        grid_spec=pltpu.PrefetchScalarGridSpec(
            num_scalar_prefetch=0,
            grid=(num_i, num_k),
            in_specs=[
                pl.BlockSpec((tn, chunk), lambda i, k: (i, k)),
                pl.BlockSpec((tn, chunk), lambda i, k: (i, k)),
            ],
            out_specs=pl.BlockSpec((1, 128), lambda i, k: (i, 0)),
            scratch_shapes=[
                pltpu.VMEM((tn, 1), jnp.float32),   # iand accumulator
                pltpu.VMEM((tn, 1), jnp.float32),   # s = sum(t) + sum(p)
            ],
        ),
        compiler_params=pltpu.CompilerParams(
            # Row blocks are independent -> shard across both v7x TCs; the HW
            # chunk axis is a reduction -> "arbitrary".
            dimension_semantics=("parallel", "arbitrary"),
            vmem_limit_bytes=vmem_limit_bytes,
        ),
    )(pred_f, target_f)

    # Every lane of a partial row holds the same broadcast value.
    # NOTE: like the PyTorch reference, a slice with sum(t)+sum(p) == 0 yields
    # NaN (0/0); only padded/over-read rows are masked out.
    return jnp.sum(partials) / (128.0 * N)


def iou_loss_ref(pred, target):
    """Pure-JAX reference mirroring the PyTorch __classes_iou loop."""
    pred = pred.astype(jnp.float32)
    target = target.astype(jnp.float32)
    B, C, _, _ = pred.shape
    total = 0.0
    for i in range(B):
        classes_iou = 0.0
        for c in range(C):
            iand = jnp.sum(target[i, c] * pred[i, c])
            ior = jnp.sum(target[i, c]) + jnp.sum(pred[i, c]) - iand
            classes_iou = classes_iou + (1.0 - iand / ior)
        total = total + classes_iou / C
    return total / B


def _make_inputs(key, shape, dtype=jnp.float32):
    k1, k2 = jax.random.split(key)
    pred = jax.nn.sigmoid(jax.random.normal(k1, shape, dtype=jnp.float32))
    target = (jax.random.uniform(k2, shape) > 0.5).astype(jnp.float32)
    return pred.astype(dtype), target.astype(dtype)


if __name__ == "__main__":
    key = jax.random.PRNGKey(0)
    k1, k2, k3, k4 = jax.random.split(key, 4)

    # Case 1: basic f32 shape (single HW chunk, N multiple of 8).
    p, t = _make_inputs(k1, (2, 4, 16, 16))
    out = jax.block_until_ready(iou_loss(p, t))
    ref = iou_loss_ref(p, t)
    assert jnp.isclose(out, ref, rtol=1e-5, atol=1e-5), ("case1", out, ref)

    # Case 2: N = 9 (not a multiple of 8) -> non-dividing row grid, no pad.
    p, t = _make_inputs(k2, (3, 3, 20, 20))
    out = jax.block_until_ready(iou_loss(p, t))
    ref = iou_loss_ref(p, t)
    assert jnp.isclose(out, ref, rtol=1e-5, atol=1e-5), ("case2", out, ref)

    # Case 3: force HW tiling + partial last chunk (column masking path).
    p, t = _make_inputs(k3, (2, 4, 48, 48))
    out = jax.block_until_ready(iou_loss(p, t, target_block_bytes=64 * 1024))
    ref = iou_loss_ref(p, t)
    assert jnp.isclose(out, ref, rtol=1e-5, atol=1e-5), ("case3", out, ref)

    # Case 4: bf16 inputs (sublane multiple 16, two parallel row blocks).
    p, t = _make_inputs(k4, (8, 4, 16, 16), dtype=jnp.bfloat16)
    out = jax.block_until_ready(iou_loss(p, t))
    ref = iou_loss_ref(p, t)
    assert jnp.isclose(out, ref, rtol=1e-5, atol=1e-5), ("case4", out, ref)

    print("KERNEL_OK")
</pallas_src>

<mosaic_0001>
module attributes {stable_mosaic.version = 11 : i64} {
  func.func @_iou_partial_kernel(%arg0: i32, %arg1: i32, %arg2: memref<8x256xf32, #tpu.memory_space<vmem>>, %arg3: memref<8x256xf32, #tpu.memory_space<vmem>>, %arg4: memref<1x128xf32, #tpu.memory_space<vmem>>, %arg5: memref<8x1xf32, #tpu.memory_space<vmem>>, %arg6: memref<8x1xf32, #tpu.memory_space<vmem>>) attributes {dimension_semantics = [#tpu.dimension_semantics<parallel>, #tpu.dimension_semantics<arbitrary>], iteration_bounds = array<i64: 1, 1>, scalar_prefetch = 0 : i64, scratch_operands = 2 : i64, tpu.core_type = #tpu.core_type<tc>, window_params = [{transform_indices = @transform_0, window_bounds = array<i64: 8, 256>}, {transform_indices = @transform_1, window_bounds = array<i64: 8, 256>}, {transform_indices = @transform_2, window_bounds = array<i64: 1, 128>}]} {
    %c0_i32 = arith.constant 0 : i32
    %0 = arith.cmpi eq, %arg1, %c0_i32 : i32
    %1 = arith.extui %0 : i1 to i32
    %c0_i32_0 = arith.constant 0 : i32
    %2 = arith.cmpi ne, %1, %c0_i32_0 : i32
    scf.if %2 {
      %cst_15 = arith.constant 0.000000e+00 : f32
      %20 = vector.broadcast %cst_15 : f32 to vector<8x1xf32>
      %c0_16 = arith.constant 0 : index
      %c0_17 = arith.constant 0 : index
      %21 = vector.load %arg5[%c0_16, %c0_17] : memref<8x1xf32, #tpu.memory_space<vmem>>, vector<8x1xf32>
      tpu.vector_store %arg5[%c0_16, %c0_17], %20 {strides = array<i32>} : memref<8x1xf32, #tpu.memory_space<vmem>>, vector<8x1xf32>,
      %cst_18 = arith.constant 0.000000e+00 : f32
      %22 = vector.broadcast %cst_18 : f32 to vector<8x1xf32>
      %c0_19 = arith.constant 0 : index
      %c0_20 = arith.constant 0 : index
      %23 = vector.load %arg6[%c0_19, %c0_20] : memref<8x1xf32, #tpu.memory_space<vmem>>, vector<8x1xf32>
      tpu.vector_store %arg6[%c0_19, %c0_20], %22 {strides = array<i32>} : memref<8x1xf32, #tpu.memory_space<vmem>>, vector<8x1xf32>,
    } else {
    }
    %c0 = arith.constant 0 : index
    %c0_1 = arith.constant 0 : index
    %3 = vector.load %arg2[%c0, %c0_1] : memref<8x256xf32, #tpu.memory_space<vmem>>, vector<8x256xf32>
    %c0_2 = arith.constant 0 : index
    %c0_3 = arith.constant 0 : index
    %4 = vector.load %arg3[%c0_2, %c0_3] : memref<8x256xf32, #tpu.memory_space<vmem>>, vector<8x256xf32>
    %c0_4 = arith.constant 0 : index
    %c0_5 = arith.constant 0 : index
    %5 = vector.load %arg5[%c0_4, %c0_5] : memref<8x1xf32, #tpu.memory_space<vmem>>, vector<8x1xf32>
    %6 = arith.mulf %4, %3 : vector<8x256xf32>
    %cst = arith.constant dense<0.000000e+00> : vector<8xf32>
    %7 = vector.multi_reduction <add>, %6, %cst [1] : vector<8x256xf32> to vector<8xf32>
    %8 = vector.shape_cast %7 : vector<8xf32> to vector<8x1xf32>
    %9 = arith.addf %5, %8 : vector<8x1xf32>
    %c0_6 = arith.constant 0 : index
    %c0_7 = arith.constant 0 : index
    %10 = vector.load %arg5[%c0_6, %c0_7] : memref<8x1xf32, #tpu.memory_space<vmem>>, vector<8x1xf32>
    tpu.vector_store %arg5[%c0_6, %c0_7], %9 {strides = array<i32>} : memref<8x1xf32, #tpu.memory_space<vmem>>, vector<8x1xf32>,
    %c0_8 = arith.constant 0 : index
    %c0_9 = arith.constant 0 : index
    %11 = vector.load %arg6[%c0_8, %c0_9] : memref<8x1xf32, #tpu.memory_space<vmem>>, vector<8x1xf32>
    %12 = arith.addf %4, %3 : vector<8x256xf32>
    %cst_10 = arith.constant dense<0.000000e+00> : vector<8xf32>
    %13 = vector.multi_reduction <add>, %12, %cst_10 [1] : vector<8x256xf32> to vector<8xf32>
    %14 = vector.shape_cast %13 : vector<8xf32> to vector<8x1xf32>
    %15 = arith.addf %11, %14 : vector<8x1xf32>
    %c0_11 = arith.constant 0 : index
    %c0_12 = arith.constant 0 : index
    %16 = vector.load %arg6[%c0_11, %c0_12] : memref<8x1xf32, #tpu.memory_space<vmem>>, vector<8x1xf32>
    tpu.vector_store %arg6[%c0_11, %c0_12], %15 {strides = array<i32>} : memref<8x1xf32, #tpu.memory_space<vmem>>, vector<8x1xf32>,
    %c0_i32_13 = arith.constant 0 : i32
    %17 = arith.cmpi eq, %arg1, %c0_i32_13 : i32
    %18 = arith.extui %17 : i1 to i32
    %c0_i32_14 = arith.constant 0 : i32
    %19 = arith.cmpi ne, %18, %c0_i32_14 : i32
    scf.if %19 {
      %c0_15 = arith.constant 0 : index
      %c0_16 = arith.constant 0 : index
      %20 = vector.load %arg5[%c0_15, %c0_16] : memref<8x1xf32, #tpu.memory_space<vmem>>, vector<8x1xf32>
      %c0_17 = arith.constant 0 : index
      %c0_18 = arith.constant 0 : index
      %21 = vector.load %arg6[%c0_17, %c0_18] : memref<8x1xf32, #tpu.memory_space<vmem>>, vector<8x1xf32>
      %22 = arith.subf %21, %20 : vector<8x1xf32>
      %23 = tpu.iota {dimensions = array<i32: 0>} : vector<8x1xi32>
      %c8_i32 = arith.constant 8 : i32
      %24 = arith.muli %arg0, %c8_i32 : i32
      %25 = vector.broadcast %24 : i32 to vector<8x1xi32>
      %26 = arith.addi %23, %25 : vector<8x1xi32>
      %c8_i32_19 = arith.constant 8 : i32
      %27 = vector.broadcast %c8_i32_19 : i32 to vector<8x1xi32>
      %28 = arith.cmpi slt, %26, %27 : vector<8x1xi32>
      %29 = arith.divf %20, %22 : vector<8x1xf32>
      %cst_20 = arith.constant 1.000000e+00 : f32
      %30 = vector.broadcast %cst_20 : f32 to vector<8x1xf32>
      %31 = arith.subf %30, %29 : vector<8x1xf32>
      %cst_21 = arith.constant 0.000000e+00 : f32
      %32 = vector.broadcast %cst_21 : f32 to vector<8x1xf32>
      %33 = arith.select %28, %31, %32 : vector<8x1xi1>, vector<8x1xf32>
      %34 = vector.shape_cast %33 : vector<8x1xf32> to vector<1x8x1xf32>
      %cst_22 = arith.constant dense<0.000000e+00> : vector<1xf32>
      %35 = vector.multi_reduction <add>, %34, %cst_22 [1, 2] : vector<1x8x1xf32> to vector<1xf32>
      %36 = vector.shape_cast %35 : vector<1xf32> to vector<1x1x1xf32>
      %37 = vector.extract %36[0, 0, 0] : f32 from vector<1x1x1xf32>
      %38 = vector.broadcast %37 : f32 to vector<1x1xf32>
      %39 = vector.shape_cast %38 : vector<1x1xf32> to vector<1x1xf32>
      %40 = vector.broadcast %39 : vector<1x1xf32> to vector<1x128xf32>
      %c0_23 = arith.constant 0 : index
      %c0_24 = arith.constant 0 : index
      %41 = vector.load %arg4[%c0_23, %c0_24] : memref<1x128xf32, #tpu.memory_space<vmem>>, vector<1x128xf32>
      tpu.vector_store %arg4[%c0_23, %c0_24], %40 {strides = array<i32>} : memref<1x128xf32, #tpu.memory_space<vmem>>, vector<1x128xf32>,
    } else {
    }
    return
  }
  func.func @transform_0(%arg0: i32, %arg1: i32) -> (i32, i32) {
    %c0_i32 = arith.constant 0 : i32
    return %arg0, %arg1 : i32, i32
  }
  func.func @transform_1(%arg0: i32, %arg1: i32) -> (i32, i32) {
    %c0_i32 = arith.constant 0 : i32
    return %arg0, %arg1 : i32, i32
  }
  func.func @transform_2(%arg0: i32, %arg1: i32) -> (i32, i32) {
    %c0_i32 = arith.constant 0 : i32
    %c0_i32_0 = arith.constant 0 : i32
    return %arg0, %c0_i32 : i32, i32
  }
}

</mosaic_0001>

<bundles_post_ra>
// kernel: tpu_custom_call.1
= control target key start
LH: loop header
LB: loop body
LE: loop exit
PB: predicated region body
PF: predicated region fallthrough
CT: control target
= control target key end

     0   :  { %7 = vsyncpa [#allocation5], 0  ;;  %s246_s0 = inlined_call_operand.hbm [shape: f32[8,256], index: 0, kind: input, shape index: {}]   ;;  %s247_s1 = inlined_call_operand.hbm [shape: f32[8,256], index: 1, kind: input, shape index: {}]   ;;  %s248_s2 = inlined_call_operand.hbm [shape: f32[1,128], index: 2, kind: output, shape index: {}]  }
   0x1   :  { %8 = vsyncpa [#allocation8], 0 }
   0x2   :  { %9 = vsyncpa [#allocation6], 0  ;;  %s15_s11 = sshll.u32 %s246_s0, 4  ;;  %s213_s12 = smov [#allocation4]   ;;  %s16_s11 = int_to_ptr.hbm [resolvable:$true] %s15_s11 }
   0x3   :  { %s17_s13 = sshll.u32 %s213_s12, 4  ;;  %s26_s16 = sshll.u32 %s247_s1, 4  ;;  %s18_s13 = int_to_ptr.vmem [resolvable:$true] %s17_s13  ;;  %s27_s16 = int_to_ptr.hbm [resolvable:$true] %s26_s16 }
   0x4   :  { %20 = dma.hbm_to_vmem [thread:$0]  %s16_s11, 256, %s18_s13, [#allocation5]  }
   0x5   :  { %s214_s17 = smov [#allocation7]  }
   0x6   :  { %s28_s18 = sshll.u32 %s214_s17, 4  ;;  %s29_s18 = int_to_ptr.vmem [resolvable:$true] %s28_s18 }
   0x7   :  { %31 = dma.hbm_to_vmem [thread:$0]  %s27_s16, 256, %s29_s18, [#allocation8]  }
   0x8   :  { %207 = dma.done.wait [#allocation5], 256  }
   0x9   :  { %208 = vsyncadd [#allocation5], 4294967040 }
   0xa   :  { %209 = dma.done.wait [#allocation8], 256  }
   0xb   :  { %210 = vsyncadd [#allocation8], 4294967040  ;;  %vm44_vm0 = vcmask 7168   ;;  %v215_v0 = vmov 0.0   ;;  %v47_v1 = vld [vmem:[#allocation4] sm:$0xff]  ;;  %v48_v2 = vld [vmem:[#allocation4 + $0x8] sm:$0xff] }
   0xc   :  { %45 = vst.msk [vmem:[#allocation2] sm:$0xff] %vm44_vm0, %v215_v0  ;;  %v49_v3 = vld [vmem:[#allocation7] sm:$0xff]  ;;  %v50_v4 = vld [vmem:[#allocation7 + $0x8] sm:$0xff]  ;;  %s216_s0 = smov [#allocation9]   ;;  %s116_s21 = sshll.u32 %s248_s2, 4  ;;  %s117_s21 = int_to_ptr.hbm [resolvable:$true] %s116_s21 }
   0xd   :  { %46 = vst.msk [vmem:[#allocation3] sm:$0xff] %vm44_vm0, %v215_v0  ;;  %v52_v5 = vmul.f32 %v49_v3, %v47_v1  ;;  %v53_v6 = vmul.f32 %v50_v4, %v48_v2  ;;  %v61_v8 = vadd.f32 %v49_v3, %v47_v1  ;;  %v62_v9 = vadd.f32 %v50_v4, %v48_v2  ;;  %s114_s1 = sshll.u32 %s216_s0, 4  ;;  %s115_s1 = int_to_ptr.vmem [resolvable:$true] %s114_s1 }
   0xf   :  { %v54_v7 = vadd.f32 %v53_v6, %v52_v5  ;;  %v63_v10 = vadd.f32 %v62_v9, %v61_v8 }
  0x11   :  { %55 = vadd.xlane.f32.xlu0 %v54_v7 }
  0x13   :  { %v51_v11 = vld [vmem:[#allocation2] sm:$0xff] }
  0x14   :  { %v60_v14 = vld [vmem:[#allocation3] sm:$0xff] }
  0x19   :  { %64 = vadd.xlane.f32.xlu0 %v63_v10 }
  0x84   :  { %v56_v12 = vpop.xlane.xlu0 %55 }
  0x85   :  { %v57_v13 = vadd.f32 %v56_v12, %v51_v11 }
  0x87   :  { %59 = vst.msk [vmem:[#allocation2] sm:$0xff] %vm44_vm0, %v57_v13 }
  0x8c   :  { %v65_v15 = vpop.xlane.xlu0 %64 }
  0x8d   :  { %v66_v16 = vadd.f32 %v65_v15, %v60_v14 }
  0x8e   :  { %v71_v17 = vld [vmem:[#allocation2] sm:$0xff] }
  0x8f   :  { %67 = vst.msk [vmem:[#allocation3] sm:$0xff] %vm44_vm0, %v66_v16 }
  0x96   :  { %v72_v18 = vld [vmem:[#allocation3] sm:$0xff] }
  0x97   :  { %v73_v19 = vsub.f32 %v72_v18, %v71_v17 }
  0x99   :  { %133 = vrcp.f32 %v73_v19  ;;  %v91_v23 = vand.u32 2147483648, %v73_v19  ;;  %v89_v25 = vand.u32 2147483647, %v73_v19  ;;  %vm85_vm2 = vweird.f32 %v73_v19 }
  0x9b   :  { %v92_v27 = vor.u32 1.1754944e-38, %v91_v23  ;;  %vm90_vm4 = vcmp.eq.f32.partialorder %v89_v25, 8.507059e+37 }
  0x9f   :  { %v134_v20 = vpop.eup %133 }
  0xa0   :  { %v81_v21 = vmul.f32 %v134_v20, %v73_v19  ;;  %vm86_vm1 = vweird.f32 %v134_v20 }
  0xa1   :  { %vm87_vm3 = vmor %vm85_vm2, %vm86_vm1 }
  0xa2   :  { %v82_v22 = vsub.f32 1.0, %v81_v21 }
  0xa4   :  { %v83_v24 = vmul.f32 %v134_v20, %v82_v22 }
  0xa6   :  { %v84_v26 = vadd.f32 %v134_v20, %v83_v24 }
  0xa8   :  { %v88_v28 = vsel %vm87_vm3, %v134_v20, %v84_v26 }
  0xa9   :  { %v93_v29 = vsel %vm90_vm4, %v92_v27, %v88_v28 }
  0xaa   :  { %v94_v30 = vmul.f32 %v93_v29, %v71_v17 }
  0xac   :  { %v95_v31 = vsub.f32 1.0, %v94_v30 }
  0xae   :  { %v97_v32 = vsel %vm44_vm0, %v95_v31, 0.0 }
  0xaf   :  { %98 = vadd.xlane.f32.xlu1 %v97_v32 }
 0x122   :  { %v99_v33 = vpop.xlane.xlu1 %98 }
 0x123   :  { %v100_v34 = vrot.slane %v99_v33, 4 }
 0x125   :  { %v101_v35 = vadd.f32 %v100_v34, %v99_v33 }
 0x127   :  { %v102_v36 = vrot.slane %v101_v35, 2 }
 0x129   :  { %v103_v37 = vadd.f32 %v102_v36, %v101_v35 }
 0x12b   :  { %v104_v38 = vrot.slane %v103_v37, 1 }
 0x12d   :  { %v105_v39 = vadd.f32 %v104_v38, %v103_v37 }
 0x12f   :  { %127 = vpush %v105_v39 }
 0x160   :  { %s128_s22 = spop %127 }
 0x161   :  { %v107_v40 = vstv %s128_s22 }
 0x162   :  { %108 = vst [vmem:[#allocation9] sm:$0x1] %v107_v40 }
 0x163   :  { %119 = dma.vmem_to_hbm [thread:$0]  %s115_s1, 16, %s117_s21, [#allocation6]  }
 0x164   :  { %211 = dma.done.wait [#allocation6], 16  }
 0x165   :  { %212 = vsyncadd [#allocation6], 4294967280 }
 0x166   :  { %124 = vsyncpa [#allocation5], 1 }
 0x167   :  { %125 = vsyncpa [#allocation8], 1 }
 0x168   :  { %126 = vsyncpa [#allocation6], 1 }

</bundles_post_ra>
